<compile_context>
chip_gen: v7x
topology: tpu7x:2x2x1
jax: 0.10.0
libtpu: 0.0.40
codegen_flags: <defaults>
</compile_context>

<pallas_src>
import functools

import jax
import jax.numpy as jnp
from jax.experimental import pallas as pl
from jax.experimental.pallas import tpu as pltpu


# ----------------------------------------------------------------------------
# Generation-aware sizing (v7x: 64 MiB VMEM/TC, 2 TCs; v5e/v6e: 128 MiB, 1 TC)
# ----------------------------------------------------------------------------
def _vmem_capacity_bytes():
    try:
        cap = getattr(pltpu.get_tpu_info(), "vmem_capacity_bytes", None)
        if cap:
            return int(cap)
    except Exception:
        pass
    return 128 * 1024 * 1024


_VMEM_CAP = _vmem_capacity_bytes()
_SMALL_VMEM = _VMEM_CAP <= 64 * 1024 * 1024        # v7x
_MAX_ROW_TILE = 256 if _SMALL_VMEM else 512        # halve activation residency on v7x


def _round_up(v, m):
    return -(-v // m) * m


def _row_tile(R):
    """Row tile: multiple of 8, <= _MAX_ROW_TILE, and >= 2 grid steps when possible
    so the "parallel" axis actually shards across v7x's two TensorCores."""
    if R <= 8:
        return R
    n_steps = max(2, pl.cdiv(R, _MAX_ROW_TILE))
    return min(_round_up(pl.cdiv(R, n_steps), 8), _MAX_ROW_TILE, _round_up(R, 8))


def _f_tile(F, H):
    """Intermediate-dim (reduction) tile.  Bounds VMEM so W1/W2 stream as
    double-buffered bf16 tiles instead of sitting fully resident.  Must divide F
    exactly (padding a reduction axis would corrupt the accumulation) and stays a
    multiple of 128 (>=512 when streaming, to keep the v5e MXU pipeline fed)."""
    budget = int(_VMEM_CAP * 0.35)                       # weights' share of VMEM
    w_bytes = lambda tf: 2 * (H * tf + tf * H) * 2       # 2 weights, bf16, double-buffered
    if w_bytes(F) <= budget or F % 128 != 0:
        return F
    tf = max(128, (budget // (2 * 2 * H * 2)) // 128 * 128)
    tf = min(tf, F)
    while tf > 128 and F % tf != 0:
        tf -= 128
    return tf if F % tf == 0 else F


def _vmem_limit(TM, TF, H, n_out, x_bytes, out_bytes):
    """Size vmem_limit_bytes from the actual (double-buffered) tiles + headroom."""
    need = (2 * TM * H * x_bytes                 # x tile
            + 2 * 2 * H * TF * 2                 # W1 + W2 tiles (bf16)
            + 2 * n_out * TM * H * out_bytes     # output tile(s)
            + TM * H * 4                         # f32 accumulator scratch
            + TM * TF * 4                        # GELU intermediate
            + 2 * H * 4)                         # steering vector
    return int(min(max(2 * need, 32 * 1024 * 1024), int(_VMEM_CAP * 0.8)))


# ----------------------------------------------------------------------------
# Pallas kernels (grid = (row_tiles, f_tiles); F axis is the reduction)
# ----------------------------------------------------------------------------
def _block_kernel(x_ref, w1_ref, w2_ref, out_ref, acc_ref):
    """acc += GELU(x @ W1[:, f]) @ W2[f, :];  out = x + acc at the last F step."""
    f = pl.program_id(1)

    @pl.when(f == 0)
    def _():
        acc_ref[...] = jnp.zeros_like(acc_ref)

    x = x_ref[...]                                                    # (TM, H)
    h = jnp.dot(x.astype(jnp.bfloat16), w1_ref[...],
                preferred_element_type=jnp.float32)                   # (TM, TF) MXU
    # TODO(synk): PyTorch nn.GELU defaults to exact erf GELU; tanh approximation
    # is used here for EUP throughput.
    h = jax.nn.gelu(h, approximate=True)                              # EUP
    acc_ref[...] += jnp.dot(h.astype(jnp.bfloat16), w2_ref[...],
                            preferred_element_type=jnp.float32)       # (TM, H) MXU

    @pl.when(f == pl.num_programs(1) - 1)
    def _():
        out_ref[...] = (x.astype(jnp.float32) + acc_ref[...]).astype(out_ref.dtype)


def _block_steer_kernel(x_ref, w1_ref, w2_ref, act_ref, *refs, write_hidden):
    """Fused block + steering add.  Optionally also writes the un-steered hidden."""
    if write_hidden:
        hidden_ref, out_ref, acc_ref = refs
    else:
        out_ref, acc_ref = refs

    f = pl.program_id(1)

    @pl.when(f == 0)
    def _():
        acc_ref[...] = jnp.zeros_like(acc_ref)

    x = x_ref[...]
    h = jnp.dot(x.astype(jnp.bfloat16), w1_ref[...],
                preferred_element_type=jnp.float32)
    h = jax.nn.gelu(h, approximate=True)
    acc_ref[...] += jnp.dot(h.astype(jnp.bfloat16), w2_ref[...],
                            preferred_element_type=jnp.float32)

    @pl.when(f == pl.num_programs(1) - 1)
    def _():
        hidden = x.astype(jnp.float32) + acc_ref[...]
        if write_hidden:
            hidden_ref[...] = hidden.astype(hidden_ref.dtype)
        out_ref[...] = (hidden + act_ref[...].astype(jnp.float32)).astype(out_ref.dtype)


# ----------------------------------------------------------------------------
# pallas_call wrappers
# ----------------------------------------------------------------------------
@jax.jit
def block_forward(x, w1, w2):
    """x: (B, S, H) -> hidden (B, S, H)."""
    B, S, H = x.shape
    F = w1.shape[1]
    R = B * S
    if w1.dtype != jnp.bfloat16:
        w1 = w1.astype(jnp.bfloat16)
    if w2.dtype != jnp.bfloat16:
        w2 = w2.astype(jnp.bfloat16)
    x2d = x.reshape(R, H)
    TM = _row_tile(R)
    TF = _f_tile(F, H)
    x_bytes = x.dtype.itemsize
    cost = pl.CostEstimate(flops=4 * R * H * F, transcendentals=R * F,
                           bytes_accessed=2 * R * H * x_bytes + 2 * H * F * 2)
    out2d = pl.pallas_call(
        _block_kernel,
        out_shape=jax.ShapeDtypeStruct((R, H), x.dtype),
        grid=(pl.cdiv(R, TM), pl.cdiv(F, TF)),
        in_specs=[
            pl.BlockSpec((TM, H), lambda i, f: (i, 0)),   # x: fetched once per row tile
            pl.BlockSpec((H, TF), lambda i, f: (0, f)),   # W1 streamed along F
            pl.BlockSpec((TF, H), lambda i, f: (f, 0)),   # W2 streamed along F
        ],
        out_specs=pl.BlockSpec((TM, H), lambda i, f: (i, 0)),
        scratch_shapes=[pltpu.VMEM((TM, H), jnp.float32)],
        compiler_params=pltpu.CompilerParams(
            dimension_semantics=("parallel", "arbitrary"),
            vmem_limit_bytes=_vmem_limit(TM, TF, H, 1, x_bytes, x_bytes)),
        cost_estimate=cost,
    )(x2d, w1, w2)
    return out2d.reshape(B, S, H)


@functools.partial(jax.jit, static_argnames=("capture_hidden",))
def block_forward_steered(x, w1, w2, act, *, capture_hidden=True):
    """Fused block + steering.  Returns (hidden, steered) if capture_hidden else steered."""
    B, S, H = x.shape
    F = w1.shape[1]
    R = B * S
    if w1.dtype != jnp.bfloat16:
        w1 = w1.astype(jnp.bfloat16)
    if w2.dtype != jnp.bfloat16:
        w2 = w2.astype(jnp.bfloat16)
    x2d = x.reshape(R, H)
    TM = _row_tile(R)
    TF = _f_tile(F, H)
    x_bytes = x.dtype.itemsize

    per_token = act.size != H
    if per_token:                      # broadcastable per-token steering (e.g. (B,S,H))
        act2d = jnp.broadcast_to(act, (B, S, H)).reshape(R, H).astype(x.dtype)
        act_spec = pl.BlockSpec((TM, H), lambda i, f: (i, 0))
    else:                              # single (H,) steering vector
        act2d = act.reshape(1, H).astype(x.dtype)
        act_spec = pl.BlockSpec((1, H), lambda i, f: (0, 0))

    n_out = 2 if capture_hidden else 1
    row_spec = pl.BlockSpec((TM, H), lambda i, f: (i, 0))
    if capture_hidden:
        out_shape = (jax.ShapeDtypeStruct((R, H), x.dtype),
                     jax.ShapeDtypeStruct((R, H), x.dtype))
        out_specs = (row_spec, row_spec)
    else:
        out_shape = jax.ShapeDtypeStruct((R, H), x.dtype)
        out_specs = row_spec

    cost = pl.CostEstimate(
        flops=4 * R * H * F, transcendentals=R * F,
        bytes_accessed=(1 + n_out) * R * H * x_bytes + 2 * H * F * 2)

    result = pl.pallas_call(
        functools.partial(_block_steer_kernel, write_hidden=capture_hidden),
        out_shape=out_shape,
        grid=(pl.cdiv(R, TM), pl.cdiv(F, TF)),
        in_specs=[
            pl.BlockSpec((TM, H), lambda i, f: (i, 0)),
            pl.BlockSpec((H, TF), lambda i, f: (0, f)),
            pl.BlockSpec((TF, H), lambda i, f: (f, 0)),
            act_spec,
        ],
        out_specs=out_specs,
        scratch_shapes=[pltpu.VMEM((TM, H), jnp.float32)],
        compiler_params=pltpu.CompilerParams(
            dimension_semantics=("parallel", "arbitrary"),
            vmem_limit_bytes=_vmem_limit(TM, TF, H, n_out, x_bytes, x_bytes)),
        cost_estimate=cost,
    )(x2d, w1, w2, act2d)

    if capture_hidden:
        hidden2d, out2d = result
        return hidden2d.reshape(B, S, H), out2d.reshape(B, S, H)
    return result.reshape(B, S, H)


# ----------------------------------------------------------------------------
# JAX/Pallas port of the PyTorch BlockOutputWrapper
# ----------------------------------------------------------------------------
class BlockOutputWrapper:
    """Wraps the representative MLP residual block (held as W1/W2) so the
    steering addition is fused into the block's pallas_call.

    Semantics match the PyTorch module: records the block's output[0] as
    `last_hidden_state` and, if `add_activations` is set, returns
    (output[0] + add_activations,) + output[1:].
    """
    # TODO(synk): fusing requires the wrapper to own the block's kernel; an
    # arbitrary opaque `block` nn.Module cannot be fused into one pallas_call.

    def __init__(self, w1, w2, capture_hidden_when_steering=True):
        # Pre-cast weights to bf16 ONCE (MXU input dtype) — avoids a full HBM
        # read+write of both weight matrices on every forward call under jit.
        self.w1 = jnp.asarray(w1, dtype=jnp.bfloat16)
        self.w2 = jnp.asarray(w2, dtype=jnp.bfloat16)
        self.capture_hidden_when_steering = capture_hidden_when_steering
        self.last_hidden_state = None
        self.add_activations = None

    def __call__(self, x):
        if self.add_activations is not None:
            if self.capture_hidden_when_steering:
                hidden, steered = block_forward_steered(
                    x, self.w1, self.w2, self.add_activations, capture_hidden=True)
                self.last_hidden_state = hidden
            else:
                # Trimmed path: only the steered output is written back to HBM;
                # the un-steered hidden state is reconstructed outside the kernel.
                steered = block_forward_steered(
                    x, self.w1, self.w2, self.add_activations, capture_hidden=False)
                self.last_hidden_state = steered - jnp.asarray(
                    self.add_activations, dtype=steered.dtype)
            return (steered,)
        hidden = block_forward(x, self.w1, self.w2)
        self.last_hidden_state = hidden
        return (hidden,)

    def add(self, activations):
        self.add_activations = activations

    def reset(self):
        self.last_hidden_state = None
        self.add_activations = None


# ----------------------------------------------------------------------------
# Demo / correctness check
# ----------------------------------------------------------------------------
if __name__ == "__main__":
    B, S, H, F = 2, 8, 128, 256

    key = jax.random.PRNGKey(0)
    kx, kw1, kw2, ka = jax.random.split(key, 4)
    x = jax.random.normal(kx, (B, S, H), dtype=jnp.float32)
    w1 = jax.random.normal(kw1, (H, F), dtype=jnp.float32) * 0.02
    w2 = jax.random.normal(kw2, (F, H), dtype=jnp.float32) * 0.02
    steer = jax.random.normal(ka, (H,), dtype=jnp.float32) * 0.1

    wrapper = BlockOutputWrapper(w1, w2)

    # 1) plain forward (no steering)
    out_plain = wrapper(x)[0]
    jax.block_until_ready(out_plain)

    # 2) steered forward (single fused pallas_call, both outputs)
    wrapper.add(steer)
    out_steered = wrapper(x)[0]
    jax.block_until_ready(out_steered)
    hidden_captured = wrapper.last_hidden_state

    # 3) steered forward, trimmed store path (single output written back)
    wrapper_trim = BlockOutputWrapper(w1, w2, capture_hidden_when_steering=False)
    wrapper_trim.add(steer)
    out_steered_trim = wrapper_trim(x)[0]
    jax.block_until_ready(out_steered_trim)

    # pure-JAX reference, matched to the kernel's bf16-input / f32-accumulate math
    f32 = jnp.float32
    xb = x.astype(jnp.bfloat16).astype(f32)
    w1b = w1.astype(jnp.bfloat16).astype(f32)
    w2b = w2.astype(jnp.bfloat16).astype(f32)
    h_ref = jax.nn.gelu(jnp.dot(xb, w1b), approximate=True)
    ref_hidden = x + jnp.dot(h_ref.astype(jnp.bfloat16).astype(f32), w2b)
    ref_steered = ref_hidden + steer[None, None, :]

    assert jnp.allclose(out_plain, ref_hidden, atol=1e-2, rtol=1e-2)
    assert jnp.allclose(hidden_captured, ref_hidden, atol=1e-2, rtol=1e-2)
    assert jnp.allclose(out_steered, ref_steered, atol=1e-2, rtol=1e-2)
    assert jnp.allclose(out_steered_trim, ref_steered, atol=1e-2, rtol=1e-2)
    assert jnp.allclose(wrapper_trim.last_hidden_state, ref_hidden, atol=2e-2, rtol=2e-2)

    wrapper.reset()
    assert wrapper.last_hidden_state is None and wrapper.add_activations is None

    print("KERNEL_OK")
</pallas_src>

<mosaic_0001>
module attributes {stable_mosaic.version = 11 : i64} {
  func.func @_block_kernel(%arg0: i32, %arg1: i32, %arg2: memref<8x128xf32, #tpu.memory_space<vmem>>, %arg3: memref<128x256xbf16, #tpu.memory_space<vmem>>, %arg4: memref<256x128xbf16, #tpu.memory_space<vmem>>, %arg5: memref<8x128xf32, #tpu.memory_space<vmem>>, %arg6: memref<8x128xf32, #tpu.memory_space<vmem>>) attributes {dimension_semantics = [#tpu.dimension_semantics<parallel>, #tpu.dimension_semantics<arbitrary>], iteration_bounds = array<i64: 2, 1>, scalar_prefetch = 0 : i64, scratch_operands = 1 : i64, tpu.core_type = #tpu.core_type<tc>, window_params = [{transform_indices = @transform_0, window_bounds = array<i64: 8, 128>}, {transform_indices = @transform_1, window_bounds = array<i64: 128, 256>}, {transform_indices = @transform_2, window_bounds = array<i64: 256, 128>}, {transform_indices = @transform_3, window_bounds = array<i64: 8, 128>}]} {
    %c0_i32 = arith.constant 0 : i32
    %0 = arith.cmpi eq, %arg1, %c0_i32 : i32
    %1 = arith.extui %0 : i1 to i32
    %c0_i32_0 = arith.constant 0 : i32
    %2 = arith.cmpi ne, %1, %c0_i32_0 : i32
    scf.if %2 {
      %cst_17 = arith.constant 0.000000e+00 : f32
      %29 = vector.broadcast %cst_17 : f32 to vector<8x128xf32>
      %c0_18 = arith.constant 0 : index
      %c0_19 = arith.constant 0 : index
      %30 = vector.load %arg6[%c0_18, %c0_19] : memref<8x128xf32, #tpu.memory_space<vmem>>, vector<8x128xf32>
      tpu.vector_store %arg6[%c0_18, %c0_19], %29 {strides = array<i32>} : memref<8x128xf32, #tpu.memory_space<vmem>>, vector<8x128xf32>,
    } else {
    }
    %c0 = arith.constant 0 : index
    %c0_1 = arith.constant 0 : index
    %3 = vector.load %arg2[%c0, %c0_1] : memref<8x128xf32, #tpu.memory_space<vmem>>, vector<8x128xf32>
    %4 = arith.truncf %3 : vector<8x128xf32> to vector<8x128xbf16>
    %c0_2 = arith.constant 0 : index
    %c0_3 = arith.constant 0 : index
    %5 = vector.load %arg3[%c0_2, %c0_3] : memref<128x256xbf16, #tpu.memory_space<vmem>>, vector<128x256xbf16>
    %cst = arith.constant dense<0.000000e+00> : vector<8x256xf32>
    %6 = tpu.matmul %4, %5, %cst {dimension_numbers = #tpu.dot_dimension_numbers<[1], [0], [0], [1], [0, 0, 1, 1], [], []>} : vector<8x128xbf16>, vector<128x256xbf16>, vector<8x256xf32> -> vector<8x256xf32>
    %7 = arith.mulf %6, %6 : vector<8x256xf32>
    %8 = arith.mulf %6, %7 : vector<8x256xf32>
    %cst_4 = arith.constant 4.471500e-02 : f32
    %9 = vector.broadcast %cst_4 : f32 to vector<8x256xf32>
    %10 = arith.mulf %9, %8 : vector<8x256xf32>
    %11 = arith.addf %6, %10 : vector<8x256xf32>
    %cst_5 = arith.constant 0.797884583 : f32
    %12 = vector.broadcast %cst_5 : f32 to vector<8x256xf32>
    %13 = arith.mulf %12, %11 : vector<8x256xf32>
    %14 = math.tanh %13 : vector<8x256xf32>
    %cst_6 = arith.constant 1.000000e+00 : f32
    %15 = vector.broadcast %cst_6 : f32 to vector<8x256xf32>
    %16 = arith.addf %15, %14 : vector<8x256xf32>
    %cst_7 = arith.constant 5.000000e-01 : f32
    %17 = vector.broadcast %cst_7 : f32 to vector<8x256xf32>
    %18 = arith.mulf %17, %16 : vector<8x256xf32>
    %19 = arith.mulf %6, %18 : vector<8x256xf32>
    %c0_8 = arith.constant 0 : index
    %c0_9 = arith.constant 0 : index
    %20 = vector.load %arg6[%c0_8, %c0_9] : memref<8x128xf32, #tpu.memory_space<vmem>>, vector<8x128xf32>
    %21 = arith.truncf %19 : vector<8x256xf32> to vector<8x256xbf16>
    %c0_10 = arith.constant 0 : index
    %c0_11 = arith.constant 0 : index
    %22 = vector.load %arg4[%c0_10, %c0_11] : memref<256x128xbf16, #tpu.memory_space<vmem>>, vector<256x128xbf16>
    %cst_12 = arith.constant dense<0.000000e+00> : vector<8x128xf32>
    %23 = tpu.matmul %21, %22, %cst_12 {dimension_numbers = #tpu.dot_dimension_numbers<[1], [0], [0], [1], [0, 0, 1, 1], [], []>} : vector<8x256xbf16>, vector<256x128xbf16>, vector<8x128xf32> -> vector<8x128xf32>
    %24 = arith.addf %20, %23 : vector<8x128xf32>
    %c0_13 = arith.constant 0 : index
    %c0_14 = arith.constant 0 : index
    %25 = vector.load %arg6[%c0_13, %c0_14] : memref<8x128xf32, #tpu.memory_space<vmem>>, vector<8x128xf32>
    tpu.vector_store %arg6[%c0_13, %c0_14], %24 {strides = array<i32>} : memref<8x128xf32, #tpu.memory_space<vmem>>, vector<8x128xf32>,
    %c0_i32_15 = arith.constant 0 : i32
    %26 = arith.cmpi eq, %arg1, %c0_i32_15 : i32
    %27 = arith.extui %26 : i1 to i32
    %c0_i32_16 = arith.constant 0 : i32
    %28 = arith.cmpi ne, %27, %c0_i32_16 : i32
    scf.if %28 {
      %c0_17 = arith.constant 0 : index
      %c0_18 = arith.constant 0 : index
      %29 = vector.load %arg6[%c0_17, %c0_18] : memref<8x128xf32, #tpu.memory_space<vmem>>, vector<8x128xf32>
      %30 = arith.addf %3, %29 : vector<8x128xf32>
      %c0_19 = arith.constant 0 : index
      %c0_20 = arith.constant 0 : index
      %31 = vector.load %arg5[%c0_19, %c0_20] : memref<8x128xf32, #tpu.memory_space<vmem>>, vector<8x128xf32>
      tpu.vector_store %arg5[%c0_19, %c0_20], %30 {strides = array<i32>} : memref<8x128xf32, #tpu.memory_space<vmem>>, vector<8x128xf32>,
    } else {
    }
    return
  }
  func.func @transform_0(%arg0: i32, %arg1: i32) -> (i32, i32) {
    %c0_i32 = arith.constant 0 : i32
    %c0_i32_0 = arith.constant 0 : i32
    return %arg0, %c0_i32 : i32, i32
  }
  func.func @transform_1(%arg0: i32, %arg1: i32) -> (i32, i32) {
    %c0_i32 = arith.constant 0 : i32
    %c0_i32_0 = arith.constant 0 : i32
    return %c0_i32, %arg1 : i32, i32
  }
  func.func @transform_2(%arg0: i32, %arg1: i32) -> (i32, i32) {
    %c0_i32 = arith.constant 0 : i32
    %c0_i32_0 = arith.constant 0 : i32
    return %arg1, %c0_i32 : i32, i32
  }
  func.func @transform_3(%arg0: i32, %arg1: i32) -> (i32, i32) {
    %c0_i32 = arith.constant 0 : i32
    %c0_i32_0 = arith.constant 0 : i32
    return %arg0, %c0_i32 : i32, i32
  }
}

</mosaic_0001>

<bundles_post_ra>
// kernel: block_forward.1
= control target key start
LH: loop header
LB: loop body
LE: loop exit
PB: predicated region body
PF: predicated region fallthrough
CT: control target
= control target key end

     0   :  { %8 = vsyncpa [#allocation4], 0  ;;  %s1370_s0 = inlined_call_operand.hbm [shape: f32[16,128], index: 0, kind: input, shape index: {}]   ;;  %s1371_s1 = inlined_call_operand.hbm [shape: bf16[128,256], index: 1, kind: input, shape index: {}]   ;;  %s1372_s2 = inlined_call_operand.hbm [shape: bf16[256,128], index: 2, kind: input, shape index: {}]   ;;  %s1373_s3 = inlined_call_operand.hbm [shape: f32[16,128], index: 3, kind: output, shape index: {}]  }
   0x1   :  { %10 = vsyncpa [#allocation4 + $0x1], 0 }
   0x2   :  { %11 = vsyncpa [#allocation7], 0 }
   0x3   :  { %12 = vsyncpa [#allocation5], 0 }
   0x4   :  { %14 = vsyncpa [#allocation5 + $0x1], 0  ;;  %s1108_s12 = smov 0   ;;  %s1110_s13 = smov 0  }
   0x5   :  { %s1112_s14 = smov 0   ;;  %s1114_s15 = smov 0  }
   0x6   :  { %s1116_s16 = smov 0   ;;  %s1118_s17 = smov 0  }
   0x7 LB: > { %s702_s18 = sadd.s32 4294967295, %s1077_s17   ;;  %s703_s19 = sadd.s32 4294967294, %s1077_s17   ;;  %s1077_s17 = sphi %s1118_s17, %s20_s17   ;;  %s1073_s16 = sphi %s1116_s16, %s1395_s16   ;;  %s1069_s15 = sphi %s1114_s15, %s1394_s15   ;;  %s1065_s14 = sphi %s1112_s14, %s1393_s14   ;;  %s1061_s13 = sphi %s1110_s13, %s1392_s13   ;;  %s1057_s12 = sphi %s1108_s12, %s1391_s12  }
   0x8   : > { %p52_p0 = scmp.ne.s32.totalorder %s1061_s13, %s1057_s12  ;;  %p1142_p1 = scmp.eq.s32.totalorder %s702_s18, 0 }
   0x9   : > { %p1146_p2 = scmp.eq.s32.totalorder %s702_s18, 1  ;;  %p134_p3 = scmp.eq.s32.totalorder %s703_s19, 1 }
   0xa   : > { %s1378_s20 = scalar_select %p1142_p1, 1, 0 }
   0xb   : > { %p1152_p4 = por %p1142_p1, %p52_p0  ;;  %p704_p5 = scmp.ge.s32.totalorder %s1077_s17, 1 }
   0xc   : > { %p1157_p6 = por %p134_p3, %p52_p0  ;;  %p141_p7 = scmp.lt.s32.totalorder %s1077_s17, 3 }
   0xd   : > { %s1380_s22 = scalar_select %p1152_p4, 1, 0 }
   0xe   : > { %s1381_s23 = scalar_select %p1157_p6, 1, 0 }
   0xf   : > { %p1162_p8 = pnand %p704_p5, %p141_p7  ;;  %s1079_s25 = smov [#allocation6]  }
  0x10   : > { %s156_s26 = sshll.u32 %s1079_s25, 4  ;;  %s1080_s28 = smov [#allocation8]   ;;  %s1166_s26 = int_to_ptr.vmem [resolvable:$true] %s156_s26 }
  0x11   : > { %p785_p9 = pneg %p1162_p8  ;;  %s172_s29 = sshll.u32 %s1080_s28, 4  ;;  %s1177_s29 = int_to_ptr.vmem [resolvable:$true] %s172_s29 }
  0x12   : > { %s905_s5 = scalar_lea.hbm %s1371_s1, 2048 }
  0x13   : > { %p1173_p11 = pnand %p785_p9, %p1142_p1  ;;  %p906_p12 = scmp.ne.s32.totalorder %s1371_s1, %s905_s5 }
  0x14   : > { %p912_p5 = scmp.lt.u32.totalorder %s905_s5, %s1371_s1 }
  0x15   : > { %p907_p13 = pneg %p1173_p11 }
  0x17   : > { %p908_p0 = pnand %p907_p13, %p906_p12 }
  0x19   : > { %p909_p3 = pneg %p908_p0 }
  0x1b   : > { %p914_p7 = pnand %p912_p5, %p909_p3 }
  0x1d   : > { %917 = shalt.err (!%p914_p7)
}
  0x1e   : > { %s918_s10 = scalar_lea.vmem %s1166_s26, 2048  ;;  %p926_p1 = scmp.lt.s32.totalorder %s1166_s26, %s1166_s26 }
  0x1f   : > { %p919_p9 = scmp.ne.s32.totalorder %s1166_s26, %s918_s10  ;;  %p927_p12 = scmp.lt.s32.totalorder %s918_s10, %s918_s10 }
  0x21   : > { %p921_p10 = pnand %p919_p9, %p907_p13  ;;  %p928_p0 = por %p927_p12, %p926_p1 }
  0x23   : > { %p922_p6 = pneg %p921_p10 }
  0x25   : > { %p929_p4 = pnand %p928_p0, %p922_p6 }
  0x27   : > { %932 = shalt.err (!%p929_p4)
}
  0x28   : > { %s1081_s11 = smov 128   ;;  %s1082_s18 = smov 8  }
  0x29   : > { %788 = dma.hbm_to_vmem [thread:$0]  (!%p1173_p11), %s1371_s1, 2048, %s1166_s26, [#allocation7], %s1081_s11, %s1081_s11, %s1082_s18  }
  0x2a   : > { %s933_s4 = scalar_lea.hbm %s1372_s2, 2048 }
  0x2b   : > { %p934_p1 = scmp.ne.s32.totalorder %s1372_s2, %s933_s4  ;;  %p940_p10 = scmp.lt.u32.totalorder %s933_s4, %s1372_s2 }
  0x2d   : > { %p936_p4 = pnand %p934_p1, %p907_p13 }
  0x2f   : > { %p937_p6 = pneg %p936_p4 }
  0x31   : > { %p942_p3 = pnand %p940_p10, %p937_p6 }
  0x33   : > { %945 = shalt.err (!%p942_p3)
}
  0x34   : > { %s946_s26 = scalar_lea.vmem %s1177_s29, 2048  ;;  %p954_p12 = scmp.lt.s32.totalorder %s1177_s29, %s1177_s29 }
  0x35   : > { %p947_p5 = scmp.ne.s32.totalorder %s1177_s29, %s946_s26  ;;  %p955_p0 = scmp.lt.s32.totalorder %s946_s26, %s946_s26 }
  0x37   : > { %p949_p7 = pnand %p947_p5, %p907_p13  ;;  %p956_p1 = por %p955_p0, %p954_p12 }
  0x39   : > { %p950_p9 = pneg %p949_p7 }
  0x3b   : > { %p957_p4 = pnand %p956_p1, %p950_p9 }
  0x3d   : > { %960 = shalt.err (!%p957_p4)
}
  0x3e   : > { %s1083_s9 = smov 64   ;;  %s1084_s10 = smov 4  }
  0x3f   : > { %791 = dma.hbm_to_vmem [thread:$0]  (!%p1173_p11), %s1372_s2, 2048, %s1177_s29, [#allocation7], %s1083_s9, %s1083_s9, %s1084_s10  }
  0x40   : > { %s32_s19 = sadd.s32 1, %s1073_s16  ;;  %s39_s25 = sadd.s32 1, %s1065_s14 }
  0x41   : > { %p34_p13 = scmp.ge.s32.totalorder %s32_s19, 2  ;;  %p46_p6 = scmp.ne.s32.totalorder %s1065_s14, %s1061_s13 }
  0x42   : > { %p47_p10 = scmp.eq.s32.totalorder %s1077_s17, 0  ;;  %p802_p3 = scmp.lt.s32.totalorder %s1077_s17, 2 }
  0x43   : > { %s1397_s19 = smov (%p34_p13, %s32_s19), 0  ;;  %p1241_p7 = por %p1146_p2, %p46_p6 }
  0x44   : > { %p48_p5 = por %p47_p10, %p46_p6  ;;  %s36_s27 = ssub.s32 %s1073_s16, %s1397_s19 }
  0x45   : > { %s1384_s28 = scalar_select %p1241_p7, 1, 0 }
  0x46   : > { %s186_s30 = sand.u32 1, %s1065_s14   ;;  %p37_p9 = scmp.eq.s32.totalorder %s36_s27, 0 }
  0x47   : > { %s708_s29 = sshll.u32 %s186_s30, 3  ;;  %s709_s4 = sshll.u32 %s1073_s16, 7 }
  0x48   : > { %s1250_s5 = scalar_select %p37_p9, %s1065_s14, %s39_s25  }
  0x49   : > { %s1255_s8 = scalar_lea.hbm %s1370_s0, %s709_s4  ;;  %s190_s21 = scalar_lea.vmem [#allocation3], %s708_s29 }
  0x4a   : > { %s197_s26 = sshll.u32 %s190_s21, 4  ;;  %p1259_p2 = pnand %p802_p3, %p48_p5  ;;  %s1263_s26 = int_to_ptr.vmem [resolvable:$true] %s197_s26 }
  0x4b   : > { %s187_s10 = scalar_lea.sflag [#allocation4], %s186_s30  ;;  %s961_s11 = scalar_lea.hbm %s1255_s8, 128 }
  0x4c   : > { %p962_p11 = scmp.ne.s32.totalorder %s1255_s8, %s961_s11  ;;  %p963_p12 = pneg %p1259_p2 }
  0x4d   : > { %s966_s27 = scalar_lea.hbm %s1370_s0, 256  ;;  %p967_p4 = scmp.lt.u32.totalorder %s1255_s8, %s1370_s0 }
  0x4e   : > { %p964_p0 = pnand %p963_p12, %p962_p11  ;;  %p968_p13 = scmp.lt.u32.totalorder %s966_s27, %s961_s11 }
  0x4f   : > { %p970_p10 = scmp.lt.u32.totalorder %s961_s11, %s1255_s8 }
  0x50   : > { %p965_p1 = pneg %p964_p0  ;;  %p969_p6 = por %p968_p13, %p967_p4 }
  0x52   : > { %p971_p3 = por %p970_p10, %p969_p6 }
  0x54   : > { %p972_p5 = pnand %p971_p3, %p965_p1 }
  0x56   : > { %975 = shalt.err (!%p972_p5)
}
  0x57   : > { %s976_s30 = scalar_lea.vmem %s1263_s26, 128  ;;  %s1085_s6 = smov [#allocation3]  }
  0x58   : > { %p977_p9 = scmp.ne.s32.totalorder %s1263_s26, %s976_s30  ;;  %s981_s7 = sshll.u32 %s1085_s6, 4  ;;  %s982_s7 = int_to_ptr.vmem [resolvable:$false] %s981_s7 }
  0x59   : > { %s983_s21 = scalar_lea.vmem %s982_s7, 256  ;;  %p984_p7 = scmp.lt.s32.totalorder %s1263_s26, %s982_s7 }
  0x5a   : > { %p979_p11 = pnand %p977_p9, %p963_p12  ;;  %p985_p4 = scmp.lt.s32.totalorder %s983_s21, %s976_s30 }
  0x5c   : > { %p980_p0 = pneg %p979_p11  ;;  %p986_p13 = por %p985_p4, %p984_p7 }
  0x5e   : > { %p987_p6 = pnand %p986_p13, %p980_p0 }
  0x60   : > { %990 = shalt.err (!%p987_p6)
}
  0x61   : > { %795 = dma.hbm_to_vmem [thread:$0]  (!%p1259_p2), %s1255_s8, 128, %s1263_s26, %s187_s10  }
  0x62   : > { %206 = sbr.rel (%p1162_p8) target bundleno = 616 (0x268), region = 32  ;;  %s1293_s11 = sand.u32 (!%p1162_p8), 1, %s1061_s13  }
  0x63   : > { %s711_s18 = sshll.u32 (!%p1162_p8), %s1293_s11, 3  ;;  %s209_s25 = scalar_lea.sflag (!%p1162_p8), [#allocation4], %s1293_s11 }
  0x64   : > { %s1299_s27 = scalar_lea.vmem (!%p1162_p8), [#allocation3], %s711_s18  ;;  %p1386_p7 = scmp.ne.s32.totalorder (!%p1162_p8), %s1380_s22, 0 }
  0x69   : > { %1044 = dma.done.wait (%p1386_p7), %s209_s25, 128  }
  0x6a   : > { %1046 = vsyncadd (%p1386_p7), %s209_s25, 4294967168  ;;  %p1387_p2 = scmp.ne.s32.totalorder %s1378_s20, 0 }
  0x6c   : > { %1048 = dma.done.wait (%p1387_p2), [#allocation7], 4096  }
  0x6d   : > { %1050 = vsyncadd (%p1387_p2), [#allocation7], 4294963200  ;;  %v1086_v0 = vmov 0   ;;  %v861_v1 = vld [vmem:[#allocation6 + $0x4] ss:$8 sps:$4 sm:$0xff]   ;;  %v1310_v17 = vld [vmem:[%s1299_s27] sm:$0xff] }
  0x6e   : > { %381 = vmatprep.mubr.bf16.mxu0 %v1086_v0  ;;  %v863_v2 = vld [vmem:[#allocation6] ss:$8 sps:$4 sm:$0xff]   ;;  %349 = vmatprep.subr.bf16.mxu0 %v861_v1  ;;  %v864_v3 = vld [vmem:[#allocation6 + $0x14] ss:$8 sps:$4 sm:$0xff]   ;;  %v866_v4 = vld [vmem:[#allocation6 + $0x10] ss:$8 sps:$4 sm:$0xff]   ;;  %v252_v18 = vpack.c.bf16 %v1310_v17, %v1310_v17 }
  0x6f   : > { %350 = vmatpush1.bf16.msra.mxu0 %v863_v2  ;;  %v867_v5 = vld [vmem:[#allocation6 + $0x24] ss:$8 sps:$4 sm:$0xff]   ;;  %v869_v6 = vld [vmem:[#allocation6 + $0x20] ss:$8 sps:$4 sm:$0xff]   ;;  %v870_v7 = vld [vmem:[#allocation6 + $0x34] ss:$8 sps:$4 sm:$0xff]  }
  0x70   : > { %351 = vmatprep.subr.bf16.mxu0 %v864_v3  ;;  %v872_v8 = vld [vmem:[#allocation6 + $0x30] ss:$8 sps:$4 sm:$0xff]   ;;  %v873_v9 = vld [vmem:[#allocation6 + $0x44] ss:$8 sps:$4 sm:$0xff]   ;;  %v875_v10 = vld [vmem:[#allocation6 + $0x40] ss:$8 sps:$4 sm:$0xff]  }
  0x71   : > { %v876_v11 = vld [vmem:[#allocation6 + $0x54] ss:$8 sps:$4 sm:$0xff]   ;;  %v878_v12 = vld [vmem:[#allocation6 + $0x50] ss:$8 sps:$4 sm:$0xff]   ;;  %v879_v13 = vld [vmem:[#allocation6 + $0x64] ss:$8 sps:$4 sm:$0xff]  }
  0x72   : > { %v881_v14 = vld [vmem:[#allocation6 + $0x60] ss:$8 sps:$4 sm:$0xff]   ;;  %v882_v15 = vld [vmem:[#allocation6 + $0x74] ss:$8 sps:$4 sm:$0xff]   ;;  %v884_v16 = vld [vmem:[#allocation6 + $0x70] ss:$8 sps:$4 sm:$0xff]  }
  0x73   : > { %352 = vmatpush1.bf16.msra.mxu0 %v866_v4  ;;  %v885_v19 = vld [vmem:[#allocation8 + $0x40] sm:$0xff]   ;;  %v887_v21 = vld [vmem:[#allocation8 + $0x48] sm:$0xff]   ;;  %v889_v23 = vld [vmem:[#allocation8 + $0x50] sm:$0xff]   ;;  %s748_s20 = sshll.u32 %s1069_s15, 7  ;;  %s242_s22 = scalar_lea.vmem [#allocation9], %s711_s18 }
  0x74   : > { %353 = vmatprep.subr.bf16.mxu0 %v867_v5  ;;  %v886_v20 = vld [vmem:[#allocation8] sm:$0xff]   ;;  %751 = vmatprep.subr.bf16.mxu1 %v885_v19  ;;  %v888_v22 = vld [vmem:[#allocation8 + $0x8] sm:$0xff]   ;;  %v890_v24 = vld [vmem:[#allocation8 + $0x10] sm:$0xff]   ;;  %s601_s24 = sshll.u32 %s242_s22, 4  ;;  %s1321_s9 = scalar_lea.hbm %s1373_s3, %s748_s20  ;;  %s1323_s24 = int_to_ptr.vmem [resolvable:$true] %s601_s24 }
  0x75   : > { %752 = vmatpush3.bf16.msra.mxu1 %v886_v20  ;;  %v891_v25 = vld [vmem:[#allocation8 + $0x58] sm:$0xff]   ;;  %v893_v27 = vld [vmem:[#allocation8 + $0x60] sm:$0xff]   ;;  %v895_v29 = vld [vmem:[#allocation8 + $0x68] sm:$0xff]   ;;  %s588_s15 = scalar_lea.sflag [#allocation5], %s1293_s11  ;;  %s991_s10 = scalar_lea.vmem %s1323_s24, 128 }
  0x76   : > { %753 = vmatprep.subr.bf16.mxu1 %v887_v21  ;;  %v892_v26 = vld [vmem:[#allocation8 + $0x18] sm:$0xff]   ;;  %v894_v28 = vld [vmem:[#allocation8 + $0x20] sm:$0xff]   ;;  %v896_v30 = vld [vmem:[#allocation8 + $0x28] sm:$0xff]   ;;  %p992_p8 = scmp.ne.s32.totalorder %s1323_s24, %s991_s10  ;;  %p1388_p12 = scmp.ne.s32.totalorder %s1384_s28, 0 }
  0x77   : > { %354 = vmatpush1.bf16.msra.mxu0 %v869_v6  ;;  %v897_v31 = vld [vmem:[#allocation8 + $0x70] sm:$0xff]   ;;  %v899_v33 = vld [vmem:[#allocation8 + $0x78] sm:$0xff]   ;;  %s1087_s29 = smov [#allocation9]  }
  0x78   : > { %355 = vmatprep.subr.bf16.mxu0 %v870_v7  ;;  %v898_v32 = vld [vmem:[#allocation8 + $0x30] sm:$0xff]   ;;  %v900_v34 = vld [vmem:[#allocation8 + $0x38] sm:$0xff]   ;;  %p993_p1 = pnand %p992_p8, %p1388_p12  ;;  %s995_s4 = sshll.u32 %s1087_s29, 4  ;;  %s996_s4 = int_to_ptr.vmem [resolvable:$false] %s995_s4 }
  0x79   : > { %754 = vmatpush3.bf16.msra.mxu1 %v888_v22  ;;  %s997_s30 = scalar_lea.vmem %s996_s4, 256  ;;  %p998_p3 = scmp.lt.s32.totalorder %s1323_s24, %s996_s4 }
  0x7a   : > { %755 = vmatprep.subr.bf16.mxu1 %v889_v23  ;;  %p994_p10 = pneg %p993_p1  ;;  %p999_p5 = scmp.lt.s32.totalorder %s997_s30, %s991_s10 }
  0x7b   : > { %356 = vmatpush1.bf16.msra.mxu0 %v872_v8 }
  0x7c   : > { %357 = vmatprep.subr.bf16.mxu0 %v873_v9  ;;  %p1000_p9 = por %p999_p5, %p998_p3 }
  0x7d   : > { %756 = vmatpush3.bf16.msra.mxu1 %v890_v24 }
  0x7e   : > { %757 = vmatprep.subr.bf16.mxu1 %v891_v25  ;;  %p1001_p11 = pnand %p1000_p9, %p994_p10 }
  0x7f   : > { %358 = vmatpush1.bf16.msra.mxu0 %v875_v10 }
  0x80   : > { %359 = vmatprep.subr.bf16.mxu0 %v876_v11 }
  0x81   : > { %758 = vmatpush3.bf16.msra.mxu1 %v892_v26 }
  0x82   : > { %759 = vmatprep.subr.bf16.mxu1 %v893_v27 }
  0x83   : > { %360 = vmatpush1.bf16.msra.mxu0 %v878_v12 }
  0x84   : > { %361 = vmatprep.subr.bf16.mxu0 %v879_v13 }
  0x85   : > { %760 = vmatpush3.bf16.msra.mxu1 %v894_v28 }
  0x86   : > { %761 = vmatprep.subr.bf16.mxu1 %v895_v29 }
  0x87   : > { %362 = vmatpush1.bf16.msra.mxu0 %v881_v14 }
  0x88   : > { %363 = vmatprep.subr.bf16.mxu0 %v882_v15 }
  0x89   : > { %762 = vmatpush3.bf16.msra.mxu1 %v896_v30 }
  0x8a   : > { %763 = vmatprep.subr.bf16.mxu1 %v897_v31 }
  0x8b   : > { %364 = vmatpush1.bf16.msra.mxu0 %v884_v16 }
  0x8d   : > { %764 = vmatpush3.bf16.msra.mxu1 %v898_v32 }
  0x8e   : > { %382 = vmatmul.mubr.bf16.vlgmr.msra.gmra.mrb[0].mxu0 %v252_v18  ;;  %765 = vmatprep.subr.bf16.mxu1 %v899_v33 }
  0x91   : > { %766 = vmatpush3.bf16.msra.mxu1 %v900_v34 }
 0x161   : > { %v383_v35 = vpop.f32.mrb[0].mxu0 }
 0x162   : > { %v390_v36 = vmul.f32 %v383_v35, %v383_v35  ;;  %v385_v37 = vpop.f32.mrb[1].mxu0 }
 0x163   : > { %v391_v38 = vmul.f32 %v385_v37, %v385_v37  ;;  %v387_v39 = vpop.f32.mrb[2].mxu0 }
 0x164   : > { %v392_v40 = vmul.f32 %v390_v36, %v383_v35  ;;  %v388_v41 = vpop.f32.mrb[3].mxu0 }
 0x165   : > { %v393_v42 = vmul.f32 %v391_v38, %v385_v37 }
 0x166   : > { %v394_v43 = vmul.f32 0.044715, %v392_v40 }
 0x167   : > { %v395_v44 = vmul.f32 0.044715, %v393_v42 }
 0x168   : > { %v396_v45 = vadd.f32 %v394_v43, %v383_v35 }
 0x169   : > { %v397_v46 = vadd.f32 %v395_v44, %v385_v37 }
 0x16a   : > { %v398_v47 = vmul.f32 0.7978846, %v396_v45 }
 0x16b   : > { %v399_v48 = vmul.f32 0.7978846, %v397_v46 }
 0x16c   : > { %901 = vtanh.f32 %v398_v47 }
 0x16d   : > { %903 = vtanh.f32 %v399_v48 }
 0x176   : > { %v902_v49 = vpop.eup %901 }
 0x177   : > { %v904_v50 = vpop.eup %903  ;;  %v402_v51 = vadd.f32 1.0, %v902_v49 }
 0x178   : > { %v403_v52 = vadd.f32 1.0, %v904_v50 }
 0x179   : > { %v404_v53 = vmul.f32 0.5, %v402_v51 }
 0x17a   : > { %v405_v54 = vmul.f32 0.5, %v403_v52 }
 0x17b   : > { %v406_v55 = vmul.f32 %v404_v53, %v383_v35 }
 0x17c   : > { %v407_v56 = vmul.f32 %v405_v54, %v385_v37 }
 0x17d   : > { %v409_v58 = vpack.c.bf16 %v406_v55, %v406_v55 }
 0x17e   : > { %v410_v57 = vpack.c.bf16 %v407_v56, %v407_v56 }
 0x180   : > { %571 = vmatprep.mubr.bf16.mxu1 %v410_v57 }
 0x181   : > { %572 = vmatmul.mubr.bf16.vlgmr.msra.gmra.mrb[0].mxu1 %v409_v58 }
 0x254   : > { %v767_v59 = vpop.f32.mrb[0].mxu1 }
 0x255   : > { %v768_v60 = vpop.f32.mrb[1].mxu1 }
 0x256   : > { %v769_v61 = vadd.f32 %v768_v60, %v767_v59  ;;  %v770_v62 = vpop.f32.mrb[2].mxu1 }
 0x257   : > { %v771_v63 = vpop.f32.mrb[3].mxu1 }
 0x258   : > { %v585_v0 = vadd.f32 %v769_v61, %v1310_v17 }
 0x25a   : > { %586 = vst [vmem:[%s242_s22] sm:$0xff] %v585_v0 }
 0x25b   : > { %1004 = shalt.err (!%p1001_p11)
}
 0x25c   : > { %s1005_s6 = scalar_lea.hbm %s1321_s9, 128  ;;  %s1009_s11 = scalar_lea.hbm %s1373_s3, 256 }
 0x25d   : > { %p1006_p0 = scmp.ne.s32.totalorder %s1321_s9, %s1005_s6  ;;  %p1010_p6 = scmp.lt.u32.totalorder %s1321_s9, %s1373_s3 }
 0x25e   : > { %p1011_p7 = scmp.lt.u32.totalorder %s1009_s11, %s1005_s6  ;;  %p1013_p8 = scmp.lt.u32.totalorder %s1005_s6, %s1321_s9 }
 0x25f   : > { %p1007_p4 = pnand %p1006_p0, %p1388_p12 }
 0x260   : > { %p1012_p2 = por %p1011_p7, %p1010_p6 }
 0x261   : > { %p1008_p13 = pneg %p1007_p4 }
 0x262   : > { %p1014_p1 = por %p1013_p8, %p1012_p2 }
 0x264   : > { %p1015_p10 = pnand %p1014_p1, %p1008_p13 }
 0x266   : > { %1018 = shalt.err (!%p1015_p10)
}
 0x267   : > { %783 = dma.vmem_to_hbm [thread:$0]  (%p1388_p12), %s1323_s24, 128, %s1321_s9, %s588_s15  }
 0x268 PF: > { %s613_s27 = sand.u32 1, %s1057_s12   ;;  %p1389_p3 = scmp.ne.s32.totalorder %s1381_s23, 0 }
 0x269   : > { %p1390_p5 = scmp.ge.s32.totalorder %s1077_s17, 2  ;;  %s614_s20 = scalar_lea.sflag [#allocation5], %s613_s27 }
 0x26b   : > { %p797_p9 = pnand %p1390_p5, %p1389_p3 }
 0x26d   : > { %1052 = dma.done.wait (!%p797_p9), %s614_s20, 128  }
 0x26e   : > { %1054 = vsyncadd (!%p797_p9), %s614_s20, 4294967168  ;;  %s20_s17 = sadd.s32 1, %s1077_s17   ;;  %s1391_s12 = smov %s1061_s13 }
 0x26f   : > { %p17_p11 = scmp.ge.s32.totalorder %s20_s17, 4   ;;  %s1392_s13 = smov %s1065_s14 }
 0x270   : > { %s1393_s14 = smov %s1250_s5  ;;  %s1394_s15 = smov %s1073_s16 }
 0x271   : > { %s1395_s16 = smov %s1397_s19  ;;  %19 = sbr.rel (!%p17_p11) target bundleno = 7 (0x7), region = 95 }
 0x278   :  { %619 = vsyncpa [#allocation4], 1 }
 0x279   :  { %621 = vsyncpa [#allocation4 + $0x1], 1 }
 0x27a   :  { %622 = vsyncpa [#allocation7], 1 }
 0x27b   :  { %623 = vsyncpa [#allocation5], 1 }
 0x27c   :  { %625 = vsyncpa [#allocation5 + $0x1], 1 }

</bundles_post_ra>
